<compile_context>
chip_gen: v6e
topology: v6e:2x2x1
jax: 0.10.0
libtpu: 0.0.40
codegen_flags: <defaults>
</compile_context>

<pallas_src>
import jax
import jax.numpy as jnp
from jax.experimental import pallas as pl
from jax.experimental.pallas import tpu as pltpu

BN_EPS = 1e-5
_VMEM_LIMIT = 48 * 1024 * 1024  # < v7x 64 MiB physical, > 32 MiB default scoped limit


def _pick_row_tile(H, target=8):
    """Largest divisor of H that is <= target (keeps tiles clean; no ragged-tile masking)."""
    target = max(1, min(H, target))
    for t in range(target, 0, -1):
        if H % t == 0:
            return t
    return H


# --------------------------------------------------------------------------------------
# Pass 1: conv (im2col, single MXU matmul) + per-tile partial BN statistics
# --------------------------------------------------------------------------------------
def _conv_stats_kernel(xp_ref, w_ref, y_ref, stat_ref):
    # xp_ref  : (H+2, W+2, Cin)  zero-padded image of this batch element (resident across h)
    # w_ref   : (9*Cin, Cout)    conv weights, tap-major along K
    # y_ref   : (TH, W, Cout)    conv output row-tile (f32)
    # stat_ref: (2, Cout)        partial [sum, sum_sq] over this tile's rows
    TH, W, Cout = y_ref.shape
    Cin = xp_ref.shape[-1]

    h = pl.program_id(1)
    row0 = pl.multiple_of(h * TH, TH)  # top row of this tile's halo window (padded coords)

    # im2col: gather the 9 taps into the K axis -> one fat matmul, K = 9*Cin.
    taps = []
    for kh in range(3):
        for kw in range(3):
            taps.append(xp_ref[pl.ds(row0 + kh, TH), pl.ds(kw, W), :])   # (TH, W, Cin)
    patches = jnp.concatenate(taps, axis=-1).reshape(TH * W, 9 * Cin)

    acc = jnp.dot(patches.astype(w_ref.dtype), w_ref[...],
                  preferred_element_type=jnp.float32)                    # (TH*W, Cout) f32

    y_ref[...] = acc.reshape(TH, W, Cout)

    # Partial per-channel statistics for the (global) batch-norm reduction.
    ssum = jnp.sum(acc, axis=0, keepdims=True)            # (1, Cout)
    ssq = jnp.sum(acc * acc, axis=0, keepdims=True)       # (1, Cout)
    stat_ref[...] = jnp.concatenate([ssum, ssq], axis=0)  # (2, Cout)


# --------------------------------------------------------------------------------------
# Pass 2: apply BN (precomputed per-channel scale/shift) + ReLU on writeback
# --------------------------------------------------------------------------------------
def _bn_relu_kernel(y_ref, scale_ref, shift_ref, o_ref):
    # y_ref: (TH, W, Cout) conv tile; scale/shift: (1, Cout); o_ref: (TH, W, Cout)
    y = y_ref[...]
    o_ref[...] = jnp.maximum(y * scale_ref[0, :] + shift_ref[0, :], 0.0)


# --------------------------------------------------------------------------------------
# Public wrapper (NCHW in / NCHW out, matching the PyTorch module)
# --------------------------------------------------------------------------------------
def conv_bn_relu(x_nchw, w_oihw, gamma, beta, *, row_tile=8, use_bf16=False):
    """x: (N, Cin, H, W) f32; w: (Cout, Cin, 3, 3) f32; returns (N, Cout, H, W) f32."""
    N, Cin, H, W = x_nchw.shape
    Cout, _, KH, KW = w_oihw.shape
    assert (KH, KW) == (3, 3), "kernel implements the module's ks=3, stride=1, padding=1 case"

    TH = _pick_row_tile(H, row_tile)
    num_h = H // TH
    grid = (N, num_h)
    Hp, Wp = H + 2, W + 2

    # Layout glue (kept in the wrapper; kernels run NHWC with Cout lane-dense).
    # NOTE: for very small Cout (e.g. 8 here) output stores are masked (lane dim < 128);
    # acceptable at these shapes — pad Cout to a multiple of 128 for production widths.
    x_nhwc = jnp.transpose(x_nchw, (0, 2, 3, 1)).astype(jnp.float32)
    x_pad = jnp.pad(x_nhwc, ((0, 0), (1, 1), (1, 1), (0, 0)))           # padding=1

    mm_dtype = jnp.bfloat16 if use_bf16 else jnp.float32
    # OIHW -> (KH, KW, Cin, Cout) -> (9*Cin, Cout), tap-major K (matches kernel concat order).
    w_k = jnp.transpose(w_oihw, (2, 3, 1, 0)).reshape(9 * Cin, Cout).astype(mm_dtype)

    itemsize = 2 if use_bf16 else 4
    cost1 = pl.CostEstimate(
        flops=2 * N * H * W * 9 * Cin * Cout,
        transcendentals=0,
        bytes_accessed=x_pad.size * 4 + w_k.size * itemsize
        + N * H * W * Cout * 4 + N * num_h * 2 * Cout * 4,
    )

    conv_out, stats = pl.pallas_call(
        _conv_stats_kernel,
        out_shape=(
            jax.ShapeDtypeStruct((N, H, W, Cout), jnp.float32),     # conv output (HBM)
            jax.ShapeDtypeStruct((N, num_h, 2, Cout), jnp.float32),  # partial BN stats
        ),
        grid_spec=pltpu.PrefetchScalarGridSpec(
            num_scalar_prefetch=0,
            grid=grid,
            in_specs=[
                # Padded image: fetched once per batch element, rows sliced in-kernel.
                pl.BlockSpec((None, Hp, Wp, Cin), lambda n, h: (n, 0, 0, 0)),
                # Weights: small, untiled, resident.
                pl.BlockSpec((9 * Cin, Cout), lambda n, h: (0, 0)),
            ],
            out_specs=[
                pl.BlockSpec((None, TH, W, Cout), lambda n, h: (n, h, 0, 0)),
                pl.BlockSpec((None, None, 2, Cout), lambda n, h: (n, h, 0, 0)),
            ],
        ),
        compiler_params=pltpu.CompilerParams(
            dimension_semantics=("parallel", "parallel"),
            vmem_limit_bytes=_VMEM_LIMIT,
        ),
        cost_estimate=cost1,
    )(x_pad, w_k)

    # Global batch statistics (training-mode BatchNorm2d: biased variance over N*H*W).
    sums = jnp.sum(stats, axis=(0, 1))                  # (2, Cout)
    cnt = float(N * H * W)
    mean = sums[0] / cnt
    var = jnp.maximum(sums[1] / cnt - mean * mean, 0.0)
    inv_std = jax.lax.rsqrt(var + BN_EPS)
    g = gamma.astype(jnp.float32)
    b = beta.astype(jnp.float32)
    scale = (g * inv_std).reshape(1, Cout)
    shift = (b - mean * g * inv_std).reshape(1, Cout)

    cost2 = pl.CostEstimate(
        flops=3 * N * H * W * Cout,
        transcendentals=0,
        bytes_accessed=2 * N * H * W * Cout * 4,
    )

    out_nhwc = pl.pallas_call(
        _bn_relu_kernel,
        out_shape=jax.ShapeDtypeStruct((N, H, W, Cout), jnp.float32),
        grid_spec=pltpu.PrefetchScalarGridSpec(
            num_scalar_prefetch=0,
            grid=grid,
            in_specs=[
                pl.BlockSpec((None, TH, W, Cout), lambda n, h: (n, h, 0, 0)),
                pl.BlockSpec((1, Cout), lambda n, h: (0, 0)),
                pl.BlockSpec((1, Cout), lambda n, h: (0, 0)),
            ],
            out_specs=pl.BlockSpec((None, TH, W, Cout), lambda n, h: (n, h, 0, 0)),
        ),
        compiler_params=pltpu.CompilerParams(
            dimension_semantics=("parallel", "parallel"),
            vmem_limit_bytes=_VMEM_LIMIT,
        ),
        cost_estimate=cost2,
    )(conv_out, scale, shift)

    return jnp.transpose(out_nhwc, (0, 3, 1, 2))  # back to NCHW
    # TODO(synk): BatchNorm running_mean/running_var buffer updates (stateful module side
    # effect, not part of the forward output) are not modeled.


# --------------------------------------------------------------------------------------
# Pure-JAX reference (matches the PyTorch module's forward in training mode)
# --------------------------------------------------------------------------------------
def _reference(x_nchw, w_oihw, gamma, beta):
    y = jax.lax.conv_general_dilated(
        x_nchw, w_oihw, window_strides=(1, 1), padding=((1, 1), (1, 1)),
        dimension_numbers=("NCHW", "OIHW", "NCHW"))
    mean = jnp.mean(y, axis=(0, 2, 3), keepdims=True)
    var = jnp.mean((y - mean) ** 2, axis=(0, 2, 3), keepdims=True)
    yn = (y - mean) * jax.lax.rsqrt(var + BN_EPS)
    yn = yn * gamma.reshape(1, -1, 1, 1) + beta.reshape(1, -1, 1, 1)
    return jnp.maximum(yn, 0.0)


if __name__ == "__main__":
    key = jax.random.PRNGKey(0)
    N, Cin, Cout, H, W = 2, 4, 8, 16, 16
    ks = 3

    kx, kw = jax.random.split(key)
    x = jax.random.normal(kx, (N, Cin, H, W), dtype=jnp.float32)

    # Deterministic parameter init matching the module's __init__:
    # kaiming_normal_(a=1): std = gain / sqrt(fan_in), gain = sqrt(2/(1+a^2)) = 1,
    # fan_in = Cin * ks * ks.  Conv bias disabled.  BatchNorm: gamma=1, beta=0.
    fan_in = Cin * ks * ks
    w = jax.random.normal(kw, (Cout, Cin, ks, ks), dtype=jnp.float32) / jnp.sqrt(float(fan_in))
    gamma = jnp.ones((Cout,), jnp.float32)
    beta = jnp.zeros((Cout,), jnp.float32)

    out = conv_bn_relu(x, w, gamma, beta)
    jax.block_until_ready(out)

    ref = _reference(x, w, gamma, beta)
    assert out.shape == (N, Cout, H, W)
    assert jnp.allclose(out, ref, atol=1e-3, rtol=1e-3), float(jnp.max(jnp.abs(out - ref)))

    print("KERNEL_OK")
</pallas_src>

<mosaic_0001>
module attributes {stable_mosaic.version = 11 : i64} {
  func.func @_conv_stats_kernel(%arg0: i32, %arg1: i32, %arg2: memref<1x18x18x4xf32, #tpu.memory_space<vmem>>, %arg3: memref<36x8xf32, #tpu.memory_space<vmem>>, %arg4: memref<1x8x16x8xf32, #tpu.memory_space<vmem>>, %arg5: memref<1x1x2x8xf32, #tpu.memory_space<vmem>>) attributes {dimension_semantics = [#tpu.dimension_semantics<parallel>, #tpu.dimension_semantics<parallel>], iteration_bounds = array<i64: 2, 2>, scalar_prefetch = 0 : i64, scratch_operands = 0 : i64, tpu.core_type = #tpu.core_type<tc>, window_params = [{transform_indices = @transform_0, window_bounds = array<i64: 1, 18, 18, 4>}, {pipeline_mode = #tpu.pipeline_mode<synchronous>, transform_indices = @transform_1, window_bounds = array<i64: 36, 8>}, {transform_indices = @transform_2, window_bounds = array<i64: 1, 8, 16, 8>}, {transform_indices = @transform_3, window_bounds = array<i64: 1, 1, 2, 8>}]} {
    %c8_i32 = arith.constant 8 : i32
    %0 = arith.muli %arg1, %c8_i32 : i32
    %1 = tpu.assume_multiple %0, 8 : i32
    %c0_i32 = arith.constant 0 : i32
    %2 = arith.addi %1, %c0_i32 : i32
    %c0 = arith.constant 0 : index
    %3 = arith.index_cast %2 : i32 to index
    %c0_0 = arith.constant 0 : index
    %c0_1 = arith.constant 0 : index
    %4 = vector.load %arg2[%c0, %3, %c0_0, %c0_1] : memref<1x18x18x4xf32, #tpu.memory_space<vmem>>, vector<1x8x16x4xf32>
    %5 = vector.shape_cast %4 : vector<1x8x16x4xf32> to vector<8x16x4xf32>
    %c0_i32_2 = arith.constant 0 : i32
    %6 = arith.addi %1, %c0_i32_2 : i32
    %c0_3 = arith.constant 0 : index
    %7 = arith.index_cast %6 : i32 to index
    %c1 = arith.constant 1 : index
    %c0_4 = arith.constant 0 : index
    %8 = vector.load %arg2[%c0_3, %7, %c1, %c0_4] : memref<1x18x18x4xf32, #tpu.memory_space<vmem>>, vector<1x8x16x4xf32>
    %9 = vector.shape_cast %8 : vector<1x8x16x4xf32> to vector<8x16x4xf32>
    %c0_i32_5 = arith.constant 0 : i32
    %10 = arith.addi %1, %c0_i32_5 : i32
    %c0_6 = arith.constant 0 : index
    %11 = arith.index_cast %10 : i32 to index
    %c2 = arith.constant 2 : index
    %c0_7 = arith.constant 0 : index
    %12 = vector.load %arg2[%c0_6, %11, %c2, %c0_7] : memref<1x18x18x4xf32, #tpu.memory_space<vmem>>, vector<1x8x16x4xf32>
    %13 = vector.shape_cast %12 : vector<1x8x16x4xf32> to vector<8x16x4xf32>
    %c1_i32 = arith.constant 1 : i32
    %14 = arith.addi %1, %c1_i32 : i32
    %c0_8 = arith.constant 0 : index
    %15 = arith.index_cast %14 : i32 to index
    %c0_9 = arith.constant 0 : index
    %c0_10 = arith.constant 0 : index
    %16 = vector.load %arg2[%c0_8, %15, %c0_9, %c0_10] : memref<1x18x18x4xf32, #tpu.memory_space<vmem>>, vector<1x8x16x4xf32>
    %17 = vector.shape_cast %16 : vector<1x8x16x4xf32> to vector<8x16x4xf32>
    %c1_i32_11 = arith.constant 1 : i32
    %18 = arith.addi %1, %c1_i32_11 : i32
    %c0_12 = arith.constant 0 : index
    %19 = arith.index_cast %18 : i32 to index
    %c1_13 = arith.constant 1 : index
    %c0_14 = arith.constant 0 : index
    %20 = vector.load %arg2[%c0_12, %19, %c1_13, %c0_14] : memref<1x18x18x4xf32, #tpu.memory_space<vmem>>, vector<1x8x16x4xf32>
    %21 = vector.shape_cast %20 : vector<1x8x16x4xf32> to vector<8x16x4xf32>
    %c1_i32_15 = arith.constant 1 : i32
    %22 = arith.addi %1, %c1_i32_15 : i32
    %c0_16 = arith.constant 0 : index
    %23 = arith.index_cast %22 : i32 to index
    %c2_17 = arith.constant 2 : index
    %c0_18 = arith.constant 0 : index
    %24 = vector.load %arg2[%c0_16, %23, %c2_17, %c0_18] : memref<1x18x18x4xf32, #tpu.memory_space<vmem>>, vector<1x8x16x4xf32>
    %25 = vector.shape_cast %24 : vector<1x8x16x4xf32> to vector<8x16x4xf32>
    %c2_i32 = arith.constant 2 : i32
    %26 = arith.addi %1, %c2_i32 : i32
    %c0_19 = arith.constant 0 : index
    %27 = arith.index_cast %26 : i32 to index
    %c0_20 = arith.constant 0 : index
    %c0_21 = arith.constant 0 : index
    %28 = vector.load %arg2[%c0_19, %27, %c0_20, %c0_21] : memref<1x18x18x4xf32, #tpu.memory_space<vmem>>, vector<1x8x16x4xf32>
    %29 = vector.shape_cast %28 : vector<1x8x16x4xf32> to vector<8x16x4xf32>
    %c2_i32_22 = arith.constant 2 : i32
    %30 = arith.addi %1, %c2_i32_22 : i32
    %c0_23 = arith.constant 0 : index
    %31 = arith.index_cast %30 : i32 to index
    %c1_24 = arith.constant 1 : index
    %c0_25 = arith.constant 0 : index
    %32 = vector.load %arg2[%c0_23, %31, %c1_24, %c0_25] : memref<1x18x18x4xf32, #tpu.memory_space<vmem>>, vector<1x8x16x4xf32>
    %33 = vector.shape_cast %32 : vector<1x8x16x4xf32> to vector<8x16x4xf32>
    %c2_i32_26 = arith.constant 2 : i32
    %34 = arith.addi %1, %c2_i32_26 : i32
    %c0_27 = arith.constant 0 : index
    %35 = arith.index_cast %34 : i32 to index
    %c2_28 = arith.constant 2 : index
    %c0_29 = arith.constant 0 : index
    %36 = vector.load %arg2[%c0_27, %35, %c2_28, %c0_29] : memref<1x18x18x4xf32, #tpu.memory_space<vmem>>, vector<1x8x16x4xf32>
    %37 = vector.shape_cast %36 : vector<1x8x16x4xf32> to vector<8x16x4xf32>
    %38 = tpu.concatenate %5, %9, %13, %17, %21, %25, %29, %33, %37 in 2 : vector<8x16x4xf32>, vector<8x16x4xf32>, vector<8x16x4xf32>, vector<8x16x4xf32>, vector<8x16x4xf32>, vector<8x16x4xf32>, vector<8x16x4xf32>, vector<8x16x4xf32>, vector<8x16x4xf32> -> vector<8x16x36xf32>
    %39 = vector.shape_cast %38 : vector<8x16x36xf32> to vector<128x36xf32>
    %c0_30 = arith.constant 0 : index
    %c0_31 = arith.constant 0 : index
    %40 = vector.load %arg3[%c0_30, %c0_31] : memref<36x8xf32, #tpu.memory_space<vmem>>, vector<36x8xf32>
    %cst = arith.constant dense<0.000000e+00> : vector<128x8xf32>
    %41 = tpu.matmul %39, %40, %cst {dimension_numbers = #tpu.dot_dimension_numbers<[1], [0], [0], [1], [0, 0, 1, 1], [], []>} : vector<128x36xf32>, vector<36x8xf32>, vector<128x8xf32> -> vector<128x8xf32>
    %42 = vector.shape_cast %41 : vector<128x8xf32> to vector<8x16x8xf32>
    %c0_32 = arith.constant 0 : index
    %c0_33 = arith.constant 0 : index
    %c0_34 = arith.constant 0 : index
    %c0_35 = arith.constant 0 : index
    %43 = vector.load %arg4[%c0_32, %c0_33, %c0_34, %c0_35] : memref<1x8x16x8xf32, #tpu.memory_space<vmem>>, vector<1x8x16x8xf32>
    %44 = vector.shape_cast %43 : vector<1x8x16x8xf32> to vector<8x16x8xf32>
    %45 = vector.shape_cast %42 : vector<8x16x8xf32> to vector<1x8x16x8xf32>
    tpu.vector_store %arg4[%c0_32, %c0_33, %c0_34, %c0_35], %45 {strides = array<i32>} : memref<1x8x16x8xf32, #tpu.memory_space<vmem>>, vector<1x8x16x8xf32>,
    %cst_36 = arith.constant dense<0.000000e+00> : vector<8xf32>
    %46 = vector.multi_reduction <add>, %41, %cst_36 [0] : vector<128x8xf32> to vector<8xf32>
    %47 = vector.shape_cast %46 : vector<8xf32> to vector<1x8xf32>
    %48 = arith.mulf %41, %41 : vector<128x8xf32>
    %cst_37 = arith.constant dense<0.000000e+00> : vector<8xf32>
    %49 = vector.multi_reduction <add>, %48, %cst_37 [0] : vector<128x8xf32> to vector<8xf32>
    %50 = vector.shape_cast %49 : vector<8xf32> to vector<1x8xf32>
    %51 = tpu.concatenate %47, %50 in 0 : vector<1x8xf32>, vector<1x8xf32> -> vector<2x8xf32>
    %c0_38 = arith.constant 0 : index
    %c0_39 = arith.constant 0 : index
    %c0_40 = arith.constant 0 : index
    %c0_41 = arith.constant 0 : index
    %52 = vector.load %arg5[%c0_38, %c0_39, %c0_40, %c0_41] : memref<1x1x2x8xf32, #tpu.memory_space<vmem>>, vector<1x1x2x8xf32>
    %53 = vector.shape_cast %52 : vector<1x1x2x8xf32> to vector<2x8xf32>
    %54 = vector.shape_cast %51 : vector<2x8xf32> to vector<1x1x2x8xf32>
    tpu.vector_store %arg5[%c0_38, %c0_39, %c0_40, %c0_41], %54 {strides = array<i32>} : memref<1x1x2x8xf32, #tpu.memory_space<vmem>>, vector<1x1x2x8xf32>,
    return
  }
  func.func @transform_0(%arg0: i32, %arg1: i32) -> (i32, i32, i32, i32) {
    %c0_i32 = arith.constant 0 : i32
    %c0_i32_0 = arith.constant 0 : i32
    %c0_i32_1 = arith.constant 0 : i32
    %c0_i32_2 = arith.constant 0 : i32
    return %arg0, %c0_i32, %c0_i32_0, %c0_i32_1 : i32, i32, i32, i32
  }
  func.func @transform_1(%arg0: i32, %arg1: i32) -> (i32, i32) {
    %c0_i32 = arith.constant 0 : i32
    %c0_i32_0 = arith.constant 0 : i32
    %c0_i32_1 = arith.constant 0 : i32
    return %c0_i32, %c0_i32_0 : i32, i32
  }
  func.func @transform_2(%arg0: i32, %arg1: i32) -> (i32, i32, i32, i32) {
    %c0_i32 = arith.constant 0 : i32
    %c0_i32_0 = arith.constant 0 : i32
    %c0_i32_1 = arith.constant 0 : i32
    return %arg0, %arg1, %c0_i32, %c0_i32_0 : i32, i32, i32, i32
  }
  func.func @transform_3(%arg0: i32, %arg1: i32) -> (i32, i32, i32, i32) {
    %c0_i32 = arith.constant 0 : i32
    %c0_i32_0 = arith.constant 0 : i32
    %c0_i32_1 = arith.constant 0 : i32
    return %arg0, %arg1, %c0_i32, %c0_i32_0 : i32, i32, i32, i32
  }
}

</mosaic_0001>

<bundles_post_ra>
// kernel: tpu_custom_call.1
= control target key start
LH: loop header
LB: loop body
LE: loop exit
PB: predicated region body
PF: predicated region fallthrough
CT: control target
= control target key end

     0   :  { %9 = vsyncpa [#allocation3], 0  ;;  %s2575_s0 = inlined_call_operand.vmem [shape: f32[2,18,18,4], index: 0, kind: input, shape index: {}]   ;;  %s2576_s1 = inlined_call_operand.vmem [shape: f32[36,8], index: 1, kind: input, shape index: {}]   ;;  %s2577_s2 = inlined_call_operand.vmem [shape: f32[2,16,16,8], index: 2, kind: output, shape index: {0}]   ;;  %s2578_s3 = inlined_call_operand.hbm [shape: f32[2,2,2,8], index: 3, kind: output, shape index: {1}]  }
   0x1   :  { %11 = vsyncpa [#allocation3 + $0x1], 0  ;;  %s1880_s12 = smov 0   ;;  %s1882_s13 = smov 0  }
   0x2   :  { %s1884_s14 = smov 0   ;;  %s1886_s15 = smov 0  }
   0x3   :  { %s1888_s16 = smov 0   ;;  %s1890_s17 = smov 0  }
   0x4   :  { %s1892_s18 = smov 0   ;;  %s1894_s19 = smov 0  }
   0x5 LB: > { %s1477_s20 = sadd.s32 4294967295, %s1849_s19   ;;  %s1478_s21 = sadd.s32 4294967294, %s1849_s19   ;;  %s1849_s19 = sphi %s1894_s19, %s17_s19   ;;  %s1845_s18 = sphi %s1892_s18, %s2587_s18   ;;  %s1841_s17 = sphi %s1890_s17, %s2586_s17   ;;  %s1837_s16 = sphi %s1888_s16, %s2585_s16   ;;  %s1833_s15 = sphi %s1886_s15, %s2584_s15   ;;  %s1829_s14 = sphi %s1884_s14, %s2583_s14   ;;  %s1825_s13 = sphi %s1882_s13, %s2582_s13   ;;  %s1821_s12 = sphi %s1880_s12, %s2581_s12  }
   0x6   : > { %s26_s22 = sadd.s32 1, %s1841_s17  ;;  %s29_s23 = sadd.s32 1, %s1845_s18 }
   0x7   : > { %p27_p0 = scmp.ge.s32.totalorder %s26_s22, 2  ;;  %p123_p1 = scmp.ne.s32.totalorder %s1829_s14, %s1825_s13 }
   0x8   : > { %p124_p2 = scmp.eq.s32.totalorder %s1477_s20, 3  ;;  %p129_p5 = scmp.ne.s32.totalorder %s1825_s13, %s1821_s12 }
   0x9   : > { %s2589_s22 = smov (%p27_p0, %s26_s22), 0  ;;  %s2591_s23 = smov (!%p27_p0, %s29_s23), %s1845_s18 }
   0xa   : > { %s109_s24 = ssub.s32 %s1841_s17, %s2589_s22  ;;  %p1931_p3 = por %p124_p2, %p123_p1 }
   0xb   : > { %p31_p4 = scmp.ge.s32.totalorder %s2591_s23, 2  ;;  %p130_p6 = scmp.eq.s32.totalorder %s1478_s21, 3 }
   0xc   : > { %p1481_p7 = scmp.ge.s32.totalorder %s1849_s19, 1  ;;  %p159_p9 = scmp.lt.s32.totalorder %s1849_s19, 5 }
   0xd   : > { %s2593_s23 = smov (%p31_p4, %s2591_s23), 0  ;;  %p1940_p8 = por %p130_p6, %p129_p5 }
   0xe   : > { %s108_s27 = ssub.s32 %s1845_s18, %s2593_s23  ;;  %s113_s28 = sadd.s32 1, %s1829_s14 }
   0xf   : > { %s110_s29 = sor.u32 %s109_s24, %s108_s27  ;;  %p160_p10 = pnand %p1481_p7, %p159_p9 }
  0x10   : > { %p111_p11 = scmp.eq.s32.totalorder %s110_s29, 0  ;;  %p193_p12 = scmp.lt.s32.totalorder (!%p160_p10), %s1837_s16, 1 }
  0x11   : > { %163 = sbr.rel (%p160_p10) target bundleno = 627 (0x273), region = 28  ;;  %s1851_s11 = smov (!%p160_p10), 8  }
  0x12   : > { %s1949_s30 = scalar_select %p111_p11, %s1829_s14, %s113_s28  }
  0x13   : > { %s1489_s5 = smul.u32 (!%p160_p10), 192, %s1833_s15  ;;  %s1852_s20 = smov (!%p160_p10), 4  }
  0x14   : > { %s1853_s21 = smov (!%p160_p10), 12   ;;  %s1854_s24 = smov (!%p160_p10), 16  }
  0x15   : > { %s1855_s27 = smov (!%p160_p10), 20   ;;  %s1856_s28 = smov (!%p160_p10), 24  }
  0x16   : > { %s1953_s4 = scalar_select %p193_p12, %s1837_s16, 1  ;;  %v1014_v11 = vld [vmem:[%s2576_s1 + $0x20] sm:$0xf]  ;;  %vm1064_vm0 = vcmask 1043456   ;;  %v1013_v12 = vld [vmem:[%s2576_s1 + $0x18] sm:$0xff]  ;;  %v1012_v15 = vld [vmem:[%s2576_s1 + $0x10] sm:$0xff] }
  0x17   : > { %1633 = vmatprep.subr.msk.mxu0 %vm1064_vm0, %v1014_v11  ;;  %1667 = vmatprep.subr.msk.mxu1 %vm1064_vm0, %v1014_v11  ;;  %v1011_v16 = vld [vmem:[%s2576_s1 + $0x8] sm:$0xff]  ;;  %v1010_v17 = vld [vmem:[%s2576_s1] sm:$0xff]  ;;  %vm874_vm1 = vcmask 31744   ;;  %vm891_vm2 = vcmask 64512   ;;  %vm908_vm3 = vcmask 97280   ;;  %vm925_vm4 = vcmask 130048  }
  0x18   : > { %s1677_s6 = smul.u32 432, %s1953_s4  ;;  %1634 = vmatpush3.msk.msra.mxu0 %vm1064_vm0, %v1014_v11  ;;  %1672 = vmatpush3.msk.msra.mxu1 %vm1064_vm0, %v1014_v11  ;;  %vm942_vm5 = vcmask 162816   ;;  %vm959_vm6 = vcmask 195584   ;;  %vm976_vm7 = vcmask 228352   ;;  %vm993_vm8 = vcmask 261120   ;;  %s190_s29 = sand.u32 1, %s1825_s13  }
  0x19   : > { %1635 = vmatprep.subr.mxu0 %v1013_v12  ;;  %1668 = vmatprep.subr.mxu1 %v1013_v12  ;;  %vm1015_vm9 = vcmask 293888   ;;  %vm1319_vm10 = vcmask 1040384   ;;  %vm1321_vm11 = vcmask 58368  }
  0x1a   : > { %s197_s9 = scalar_lea.vmem %s2575_s0, %s1677_s6  ;;  %1636 = vmatpush3.msra.mxu0 %v1013_v12  ;;  %1673 = vmatpush3.msra.mxu1 %v1013_v12  ;;  %s1857_s6 = smov 28  }
  0x1b   : > { %s1960_s10 = scalar_lea.vmem %s197_s9, %s1489_s5  ;;  %1637 = vmatprep.subr.mxu0 %v1012_v15  ;;  %1669 = vmatprep.subr.mxu1 %v1012_v15  ;;  %s1858_s9 = smov 32  }
  0x1c   : > { %v244_v0 = vld [vmem:[%s1960_s10 + $0x2] sm:$0xff]  ;;  %v245_v2 = vld [vmem:[%s1960_s10 + $0xa] sm:$0xff]  ;;  %v1974_v5 = vld [vmem:[%s1960_s10 + $0x18] sm:$0xff]  ;;  %1638 = vmatpush3.msra.mxu0 %v1012_v15  ;;  %1674 = vmatpush3.msra.mxu1 %v1012_v15  ;;  %s1482_s5 = sshll.u32 %s190_s29, 1 }
  0x1d   : > { %v228_v1 = vld [vmem:[%s1960_s10 + $0x1] sm:$0xff]  ;;  %442 = vrot.lane.b32.xlu1 %v244_v0, %s1851_s11  ;;  %v229_v3 = vld [vmem:[%s1960_s10 + $0x9] sm:$0xff]  ;;  %v230_v6 = vld [vmem:[%s1960_s10 + $0x19] sm:$0xff]  ;;  %1639 = vmatprep.subr.mxu0 %v1011_v16 }
  0x1e   : > { %378 = vrot.lane.b32.xlu0 %v228_v1, %s1852_s20  ;;  %v1971_v4 = vld [vmem:[%s1960_s10 + $0x20] sm:$0xff]  ;;  %v1990_v9 = vld [vmem:[%s1960_s10 + $0x30] sm:$0xff]  ;;  %v2007_v14 = vld [vmem:[%s1960_s10 + $0x38] sm:$0xff]  ;;  %1670 = vmatprep.subr.mxu1 %v1011_v16 }
  0x1f   : > { %v1524_v7 = vld [vmem:[%s1960_s10 + $0x1a] sm:$0xff]  ;;  %v1525_v10 = vld [vmem:[%s1960_s10 + $0x22] sm:$0xff]  ;;  %v1558_v13 = vld [vmem:[%s1960_s10 + $0x31] sm:$0xff]  ;;  %1640 = vmatpush3.msra.mxu0 %v1011_v16  ;;  %1675 = vmatpush3.msra.mxu1 %v1011_v16 }
  0x20   : > { %v1509_v8 = vld [vmem:[%s1960_s10 + $0x21] sm:$0xff]  ;;  %v1574_v18 = vld [vmem:[%s1960_s10 + $0x32] sm:$0xff]  ;;  %1641 = vmatprep.subr.mxu0 %v1010_v17  ;;  %1671 = vmatprep.subr.mxu1 %v1010_v17  ;;  %v1560_v22 = vld [vmem:[%s1960_s10 + $0x49] sm:$0xff] }
  0x21   : > { %444 = vrot.lane.b32.xlu1 %v245_v2, %s1851_s11  ;;  %v1559_v19 = vld [vmem:[%s1960_s10 + $0x39] sm:$0xff]  ;;  %1642 = vmatpush3.msra.mxu0 %v1010_v17  ;;  %v2036_v21 = vld [vmem:[%s1960_s10 + $0x48] sm:$0xff]  ;;  %v2046_v23 = vld [vmem:[%s1960_s10 + $0x50] sm:$0xff] }
  0x22   : > { %380 = vrot.lane.b32.xlu0 %v229_v3, %s1852_s20  ;;  %1676 = vmatpush3.msra.mxu1 %v1010_v17  ;;  %v1575_v20 = vld [vmem:[%s1960_s10 + $0x3a] sm:$0xff]  ;;  %v1576_v24 = vld [vmem:[%s1960_s10 + $0x4a] sm:$0xff]  ;;  %v1577_v26 = vld [vmem:[%s1960_s10 + $0x52] sm:$0xff] }
  0x23   : > { %v1561_v25 = vld [vmem:[%s1960_s10 + $0x51] sm:$0xff]  ;;  %v2066_v27 = vld [vmem:[%s1960_s10 + $0x60] sm:$0xff]  ;;  %v2076_v29 = vld [vmem:[%s1960_s10 + $0x68] sm:$0xff] }
  0x24   : > { %v1562_v28 = vld [vmem:[%s1960_s10 + $0x61] sm:$0xff]  ;;  %v1563_v31 = vld [vmem:[%s1960_s10 + $0x69] sm:$0xff]  ;;  %v2096_v35 = vld [vmem:[%s1960_s10 + $0x78] sm:$0xff] }
  0x25   : > { %508 = vrot.lane.b32.xlu1 %v1971_v4, %s1853_s21  ;;  %v1578_v30 = vld [vmem:[%s1960_s10 + $0x62] sm:$0xff]  ;;  %v1579_v32 = vld [vmem:[%s1960_s10 + $0x6a] sm:$0xff]  ;;  %v1564_v40 = vld [vmem:[%s1960_s10 + $0x79] sm:$0xff] }
  0x26   : > { %506 = vrot.lane.b32.xlu0 %v1974_v5, %s1853_s21  ;;  %v2110_v41 = vld [vmem:[%s1960_s10 + $0x80] sm:$0xff]  ;;  %v2143_v60 = vld [vmem:[%s1960_s10 + $0x90] sm:$0xff]  ;;  %v213_v0 = vld [vmem:[%s1960_s10 + $0x8] sm:$0xff] }
  0x27   : > { %v1580_v46 = vld [vmem:[%s1960_s10 + $0x7a] sm:$0xff]  ;;  %v1581_v52 = vld [vmem:[%s1960_s10 + $0x82] sm:$0xff] }
  0x28   : > { %v1565_v47 = vld [vmem:[%s1960_s10 + $0x81] sm:$0xff]  ;;  %v2168_v15 = vld [vmem:[%s1960_s10 + $0x98] sm:$0xff] }
  0x29   : > { %382 = vrot.lane.b32.xlu1 %v230_v6, %s1852_s20  ;;  %v212_v55 = vld [vmem:[%s1960_s10] sm:$0xff] }
  0x2a   : > { %570 = vrot.lane.b32.xlu0 %v230_v6, %s1854_s24 }
  0x2d   : > { %634 = vrot.lane.b32.xlu1 %v1524_v7, %s1855_s27 }
  0x2e   : > { %572 = vrot.lane.b32.xlu0 %v1509_v8, %s1854_s24 }
  0x31   : > { %446 = vrot.lane.b32.xlu1 %v1524_v7, %s1851_s11 }
  0x32   : > { %384 = vrot.lane.b32.xlu0 %v1509_v8, %s1852_s20 }
  0x35   : > { %698 = vrot.lane.b32.xlu1 %v1990_v9, %s1856_s28 }
  0x36   : > { %636 = vrot.lane.b32.xlu0 %v1525_v10, %s1855_s27 }
  0x39   : > { %510 = vrot.lane.b32.xlu1 %v1990_v9, %s1853_s21 }
  0x3a   : > { %448 = vrot.lane.b32.xlu0 %v1525_v10, %s1851_s11 }
  0x3d   : > { %762 = vrot.lane.b32.xlu1 %v1558_v13, %s1857_s6 }
  0x3e   : > { %700 = vrot.lane.b32.xlu0 %v2007_v14, %s1856_s28 }
  0x41   : > { %574 = vrot.lane.b32.xlu1 %v1558_v13, %s1854_s24 }
  0x42   : > { %512 = vrot.lane.b32.xlu0 %v2007_v14, %s1853_s21 }
  0x45   : > { %826 = vrot.lane.b32.xlu1 %v1574_v18, %s1858_s9 }
  0x46   : > { %764 = vrot.lane.b32.xlu0 %v1559_v19, %s1857_s6 }
  0x49   : > { %576 = vrot.lane.b32.xlu1 %v1559_v19, %s1854_s24 }
  0x4a   : > { %386 = vrot.lane.b32.xlu0 %v1558_v13, %s1852_s20  ;;  %v1566_v13 = vld [vmem:[%s1960_s10 + $0x91] sm:$0xff] }
  0x4d   : > { %828 = vrot.lane.b32.xlu1 %v1575_v20, %s1858_s9 }
  0x4e   : > { %638 = vrot.lane.b32.xlu0 %v1574_v18, %s1855_s27 }
  0x51   : > { %450 = vrot.lane.b32.xlu1 %v1574_v18, %s1851_s11 }
  0x52   : > { %388 = vrot.lane.b32.xlu0 %v1559_v19, %s1852_s20 }
  0x55   : > { %702 = vrot.lane.b32.xlu1 %v2036_v21, %s1856_s28 }
  0x56   : > { %640 = vrot.lane.b32.xlu0 %v1575_v20, %s1855_s27 }
  0x59   : > { %514 = vrot.lane.b32.xlu1 %v2036_v21, %s1853_s21 }
  0x5a   : > { %452 = vrot.lane.b32.xlu0 %v1575_v20, %s1851_s11 }
  0x5d   : > { %766 = vrot.lane.b32.xlu1 %v1560_v22, %s1857_s6 }
  0x5e   : > { %704 = vrot.lane.b32.xlu0 %v2046_v23, %s1856_s28 }
  0x61   : > { %578 = vrot.lane.b32.xlu1 %v1560_v22, %s1854_s24 }
  0x62   : > { %516 = vrot.lane.b32.xlu0 %v2046_v23, %s1853_s21 }
  0x65   : > { %830 = vrot.lane.b32.xlu1 %v1576_v24, %s1858_s9 }
  0x66   : > { %768 = vrot.lane.b32.xlu0 %v1561_v25, %s1857_s6 }
  0x69   : > { %580 = vrot.lane.b32.xlu1 %v1561_v25, %s1854_s24 }
  0x6a   : > { %390 = vrot.lane.b32.xlu0 %v1560_v22, %s1852_s20 }
  0x6d   : > { %832 = vrot.lane.b32.xlu1 %v1577_v26, %s1858_s9 }
  0x6e   : > { %642 = vrot.lane.b32.xlu0 %v1576_v24, %s1855_s27 }
  0x71   : > { %454 = vrot.lane.b32.xlu1 %v1576_v24, %s1851_s11 }
  0x72   : > { %392 = vrot.lane.b32.xlu0 %v1561_v25, %s1852_s20 }
  0x75   : > { %706 = vrot.lane.b32.xlu1 %v2066_v27, %s1856_s28 }
  0x76   : > { %644 = vrot.lane.b32.xlu0 %v1577_v26, %s1855_s27 }
  0x79   : > { %518 = vrot.lane.b32.xlu1 %v2066_v27, %s1853_s21 }
  0x7a   : > { %456 = vrot.lane.b32.xlu0 %v1577_v26, %s1851_s11 }
  0x7d   : > { %770 = vrot.lane.b32.xlu1 %v1562_v28, %s1857_s6 }
  0x7e   : > { %708 = vrot.lane.b32.xlu0 %v2076_v29, %s1856_s28 }
  0x81   : > { %582 = vrot.lane.b32.xlu1 %v1562_v28, %s1854_s24 }
  0x82   : > { %520 = vrot.lane.b32.xlu0 %v2076_v29, %s1853_s21 }
  0x85   : > { %834 = vrot.lane.b32.xlu1 %v1578_v30, %s1858_s9 }
  0x86   : > { %772 = vrot.lane.b32.xlu0 %v1563_v31, %s1857_s6 }
  0x89   : > { %584 = vrot.lane.b32.xlu1 %v1563_v31, %s1854_s24 }
  0x8a   : > { %394 = vrot.lane.b32.xlu0 %v1562_v28, %s1852_s20 }
  0x8d   : > { %836 = vrot.lane.b32.xlu1 %v1579_v32, %s1858_s9 }
  0x8e   : > { %646 = vrot.lane.b32.xlu0 %v1578_v30, %s1855_s27 }
  0x8f   : > { %v443_v33 = vpop.permute.xlu1 %442 }
  0x90   : > { %v379_v34 = vpop.permute.xlu0 %378 }
  0x91   : > { %458 = vrot.lane.b32.xlu1 %v1578_v30, %s1851_s11  ;;  %v875_v56 = vsel %vm874_vm1, %v212_v55, %v379_v34  ;;  %v1582_v30 = vld [vmem:[%s1960_s10 + $0x92] sm:$0xff] }
  0x92   : > { %396 = vrot.lane.b32.xlu0 %v1563_v31, %s1852_s20  ;;  %v892_v59 = vsel %vm891_vm2, %v875_v56, %v443_v33  ;;  %v1567_v31 = vld [vmem:[%s1960_s10 + $0x99] sm:$0xff] }
  0x93   : > { %v2098_v36 = vpop.permute.xlu1 %444 }
  0x94   : > { %v381_v37 = vpop.permute.xlu0 %380 }
  0x95   : > { %710 = vrot.lane.b32.xlu1 %v2096_v35, %s1856_s28  ;;  %v876_v6 = vsel %vm874_vm1, %v213_v0, %v381_v37  ;;  %v1583_v37 = vld [vmem:[%s1960_s10 + $0x9a] sm:$0xff] }
  0x96   : > { %648 = vrot.lane.b32.xlu0 %v1579_v32, %s1855_s27  ;;  %v893_v12 = vsel %vm891_vm2, %v876_v6, %v2098_v36 }
  0x97   : > { %v2103_v38 = vpop.permute.xlu1 %508 }
  0x98   : > { %v507_v39 = vpop.permute.xlu0 %506  ;;  %v910_v16 = vsel %vm908_vm3, %v893_v12, %v2103_v38 }
  0x99   : > { %522 = vrot.lane.b32.xlu1 %v2096_v35, %s1853_s21  ;;  %v909_v61 = vsel %vm908_vm3, %v892_v59, %v507_v39  ;;  %v1568_v59 = vld [vmem:[%s1960_s10 + $0xa9] sm:$0xff] }
  0x9a   : > { %460 = vrot.lane.b32.xlu0 %v1579_v32, %s1851_s11 }
  0x9b   : > { %v2112_v42 = vpop.permute.xlu1 %382 }
  0x9c   : > { %v571_v43 = vpop.permute.xlu0 %570 }
  0x9d   : > { %774 = vrot.lane.b32.xlu1 %v1564_v40, %s1857_s6  ;;  %v926_v1 = vsel %vm925_vm4, %v909_v61, %v571_v43  ;;  %v2237_v61 = vld [vmem:[%s1960_s10 + $0xb0] sm:$0xff] }
  0x9e   : > { %712 = vrot.lane.b32.xlu0 %v2110_v41, %s1856_s28 }
  0x9f   : > { %v635_v44 = vpop.permute.xlu1 %634 }
  0xa0   : > { %v573_v45 = vpop.permute.xlu0 %572  ;;  %v943_v2 = vsel %vm942_vm5, %v926_v1, %v635_v44  ;;  %v877_v44 = vsel %vm874_vm1, %v1974_v5, %v2112_v42 }
  0xa1   : > { %586 = vrot.lane.b32.xlu1 %v1564_v40, %s1854_s24  ;;  %v927_v19 = vsel %vm925_vm4, %v910_v16, %v573_v45  ;;  %v1585_v16 = vld [vmem:[%s1960_s10 + $0xb2] sm:$0xff] }
  0xa2   : > { %524 = vrot.lane.b32.xlu0 %v2110_v41, %s1853_s21 }
  0xa3   : > { %v2122_v48 = vpop.permute.xlu1 %446 }
  0xa4   : > { %v2124_v49 = vpop.permute.xlu0 %384  ;;  %v894_v45 = vsel %vm891_vm2, %v877_v44, %v2122_v48  ;;  %v1570_v44 = vld [vmem:[%s1960_s10 + $0xc1] sm:$0xff] }
  0xa5   : > { %838 = vrot.lane.b32.xlu1 %v1580_v46, %s1858_s9 }
  0xa6   : > { %776 = vrot.lane.b32.xlu0 %v1565_v47, %s1857_s6 }
  0xa7   : > { %v699_v50 = vpop.permute.xlu1 %698 }
  0xa8   : > { %v637_v51 = vpop.permute.xlu0 %636  ;;  %v960_v3 = vsel %vm959_vm6, %v943_v2, %v699_v50 }
  0xa9   : > { %588 = vrot.lane.b32.xlu1 %v1565_v47, %s1854_s24  ;;  %v944_v20 = vsel %vm942_vm5, %v927_v19, %v637_v51 }
  0xaa   : > { %398 = vrot.lane.b32.xlu0 %v1564_v40, %s1852_s20 }
  0xab   : > { %v2131_v53 = vpop.permute.xlu1 %510 }
  0xac   : > { %v2133_v54 = vpop.permute.xlu0 %448 }
  0xad   : > { %840 = vrot.lane.b32.xlu1 %v1581_v52, %s1858_s9 }
  0xae   : > { %650 = vrot.lane.b32.xlu0 %v1580_v46, %s1855_s27 }
  0xaf   : > { %v763_v57 = vpop.permute.xlu1 %762 }
  0xb0   : > { %v701_v58 = vpop.permute.xlu0 %700  ;;  %v977_v7 = vsel %vm976_vm7, %v960_v3, %v763_v57  ;;  %v878_v57 = vsel %vm874_vm1, %v1971_v4, %v2124_v49 }
  0xb1   : > { %462 = vrot.lane.b32.xlu1 %v1580_v46, %s1851_s11  ;;  %v961_v22 = vsel %vm959_vm6, %v944_v20, %v701_v58  ;;  %v2211_v46 = vld [vmem:[%s1960_s10 + $0xa8] sm:$0xff]  ;;  %v895_v58 = vsel %vm891_vm2, %v878_v57, %v2133_v54 }
  0xb2   : > { %400 = vrot.lane.b32.xlu0 %v1565_v47, %s1852_s20  ;;  %v911_v47 = vsel %vm908_vm3, %v894_v45, %v2131_v53  ;;  %v1555_v45 = vld [vmem:[%s1960_s10 + $0xc8] sm:$0xff] }
  0xb3   : > { %v2146_v62 = vpop.permute.xlu1 %574 }
  0xb4   : > { %v2148_v63 = vpop.permute.xlu0 %512  ;;  %v928_v5 = vsel %vm925_vm4, %v911_v47, %v2146_v62 }
  0xb5   : > { %714 = vrot.lane.b32.xlu1 %v2143_v60, %s1856_s28  ;;  %v912_v62 = vsel %vm908_vm3, %v895_v58, %v2148_v63 }
  0xb6   : > { %652 = vrot.lane.b32.xlu0 %v1581_v52, %s1855_s27 }
  0xb7   : > { %v827_v8 = vpop.permute.xlu1 %826 }
  0xb8   : > { %v765_v10 = vpop.permute.xlu0 %764  ;;  %v994_v11 = vsel %vm993_vm8, %v977_v7, %v827_v8  ;;  %v1584_v7 = vld [vmem:[%s1960_s10 + $0xaa] sm:$0xff] }
  0xb9   : > { %526 = vrot.lane.b32.xlu1 %v2143_v60, %s1853_s21  ;;  %1643 = vmatprep.mubr.msk.f32.mxu0 %vm1015_vm9, %v994_v11  ;;  %v978_v24 = vsel %vm976_vm7, %v961_v22, %v765_v10  ;;  %v1569_v8 = vld [vmem:[%s1960_s10 + $0xb1] sm:$0xff] }
  0xba   : > { %464 = vrot.lane.b32.xlu0 %v1581_v52, %s1851_s11 }
  0xbb   : > { %v577_v17 = vpop.permute.xlu1 %576 }
  0xbc   : > { %v2172_v18 = vpop.permute.xlu0 %386  ;;  %v929_v49 = vsel %vm925_vm4, %v912_v62, %v577_v17  ;;  %v1539_v62 = vld [vmem:[%s1960_s10 + $0xca] sm:$0xff] }
  0xbd   : > { %778 = vrot.lane.b32.xlu1 %v1566_v13, %s1857_s6 }
  0xbe   : > { %716 = vrot.lane.b32.xlu0 %v2168_v15, %s1856_s28 }
  0xbf   : > { %v829_v25 = vpop.permute.xlu1 %828 }
  0xc0   : > { %v639_v26 = vpop.permute.xlu0 %638  ;;  %v995_v28 = vsel %vm993_vm8, %v978_v24, %v829_v25  ;;  %v879_v24 = vsel %vm874_vm1, %v1990_v9, %v2172_v18 }
  0xc1   : > { %590 = vrot.lane.b32.xlu1 %v1566_v13, %s1854_s24  ;;  %1644 = vmatmul.mubr.msk.f32.vlgmr.msra.gmra.mxu0 %vm1015_vm9, %v995_v28  ;;  %v945_v42 = vsel %vm942_vm5, %v928_v5, %v639_v26  ;;  %v1554_v26 = vld [vmem:[%s1960_s10 + $0xc0] sm:$0xff] }
  0xc2   : > { %528 = vrot.lane.b32.xlu0 %v2168_v15, %s1853_s21 }
  0xc3   : > { %v2188_v32 = vpop.permute.xlu1 %450 }
  0xc4   : > { %v2190_v33 = vpop.permute.xlu0 %388  ;;  %v896_v25 = vsel %vm891_vm2, %v879_v24, %v2188_v32  ;;  %v1588_v24 = vld [vmem:[%s1960_s10 + $0xda] sm:$0xff] }
  0xc5   : > { %842 = vrot.lane.b32.xlu1 %v1582_v30, %s1858_s9 }
  0xc6   : > { %780 = vrot.lane.b32.xlu0 %v1567_v31, %s1857_s6 }
  0xc7   : > { %v703_v34 = vpop.permute.xlu1 %702 }
  0xc8   : > { %v641_v36 = vpop.permute.xlu0 %640  ;;  %v962_v48 = vsel %vm959_vm6, %v945_v42, %v703_v34 }
  0xc9   : > { %592 = vrot.lane.b32.xlu1 %v1567_v31, %s1854_s24  ;;  %v946_v1 = vsel %vm942_vm5, %v929_v49, %v641_v36 }
  0xca   : > { %402 = vrot.lane.b32.xlu0 %v1566_v13, %s1852_s20 }
  0xcb   : > { %v2197_v38 = vpop.permute.xlu1 %514 }
  0xcc   : > { %v2199_v39 = vpop.permute.xlu0 %452  ;;  %v913_v28 = vsel %vm908_vm3, %v896_v25, %v2197_v38 }
  0xcd   : > { %844 = vrot.lane.b32.xlu1 %v1583_v37, %s1858_s9 }
  0xce   : > { %654 = vrot.lane.b32.xlu0 %v1582_v30, %s1855_s27 }
  0xcf   : > { %v767_v40 = vpop.permute.xlu1 %766 }
  0xd0   : > { %v705_v43 = vpop.permute.xlu0 %704  ;;  %v979_v52 = vsel %vm976_vm7, %v962_v48, %v767_v40  ;;  %v880_v40 = vsel %vm874_vm1, %v2007_v14, %v2190_v33 }
  0xd1   : > { %466 = vrot.lane.b32.xlu1 %v1582_v30, %s1851_s11  ;;  %v963_v54 = vsel %vm959_vm6, %v946_v1, %v705_v43  ;;  %v897_v43 = vsel %vm891_vm2, %v880_v40, %v2199_v39  ;;  %v1557_v1 = vld [vmem:[%s1960_s10 + $0xe0] sm:$0xff] }
  0xd2   : > { %404 = vrot.lane.b32.xlu0 %v1567_v31, %s1852_s20 }
  0xd3   : > { %v579_v50 = vpop.permute.xlu1 %578 }
  0xd4   : > { %v2215_v51 = vpop.permute.xlu0 %516  ;;  %v930_v34 = vsel %vm925_vm4, %v913_v28, %v579_v50 }
  0xd5   : > { %718 = vrot.lane.b32.xlu1 %v2211_v46, %s1856_s28  ;;  %v914_v47 = vsel %vm908_vm3, %v897_v43, %v2215_v51 }
  0xd6   : > { %656 = vrot.lane.b32.xlu0 %v1583_v37, %s1855_s27 }
  0xd7   : > { %v831_v53 = vpop.permute.xlu1 %830 }
  0xd8   : > { %v769_v55 = vpop.permute.xlu0 %768  ;;  %v996_v56 = vsel %vm993_vm8, %v979_v52, %v831_v53  ;;  %v1586_v53 = vld [vmem:[%s1960_s10 + $0xc2] sm:$0xff] }
  0xd9   : > { %530 = vrot.lane.b32.xlu1 %v2211_v46, %s1853_s21  ;;  %1646 = vmatprep.mubr.msk.f32.mxu0 %vm1015_vm9, %v996_v56  ;;  %v980_v2 = vsel %vm976_vm7, %v963_v54, %v769_v55  ;;  %v1571_v55 = vld [vmem:[%s1960_s10 + $0xc9] sm:$0xff]  ;;  %v1556_v54 = vld [vmem:[%s1960_s10 + $0xd8] sm:$0xff] }
  0xda   : > { %468 = vrot.lane.b32.xlu0 %v1583_v37, %s1851_s11 }
  0xdb   : > { %v581_v0 = vpop.permute.xlu1 %580 }
  0xdc   : > { %v2241_v4 = vpop.permute.xlu0 %390  ;;  %v931_v14 = vsel %vm925_vm4, %v914_v47, %v581_v0 }
  0xdd   : > { %782 = vrot.lane.b32.xlu1 %v1568_v59, %s1857_s6 }
  0xde   : > { %720 = vrot.lane.b32.xlu0 %v2237_v61, %s1856_s28 }
  0xdf   : > { %v833_v3 = vpop.permute.xlu1 %832 }
  0xe0   : > { %v643_v63 = vpop.permute.xlu0 %642  ;;  %v997_v6 = vsel %vm993_vm8, %v980_v2, %v833_v3 }
  0xe1   : > { %594 = vrot.lane.b32.xlu1 %v1568_v59, %s1854_s24  ;;  %1647 = vmatmul.mubr.msk.f32.gmra.mxu0 %vm1015_vm9, %v997_v6  ;;  %v947_v9 = vsel %vm942_vm5, %v930_v34, %v643_v63  ;;  %v881_v63 = vsel %vm874_vm1, %v2036_v21, %v2241_v4  ;;  %v1589_v4 = vld [vmem:[%s1960_s10 + $0xe2] sm:$0xff] }
  0xe2   : > { %532 = vrot.lane.b32.xlu0 %v2237_v61, %s1853_s21 }
  0xe3   : > { %v2257_v10 = vpop.permute.xlu1 %454 }
  0xe4   : > { %v2259_v11 = vpop.permute.xlu0 %392  ;;  %v898_v6 = vsel %vm891_vm2, %v881_v63, %v2257_v10 }
  0xe5   : > { %846 = vrot.lane.b32.xlu1 %v1584_v7, %s1858_s9  ;;  %v882_v28 = vsel %vm874_vm1, %v2046_v23, %v2259_v11 }
  0xe6   : > { %784 = vrot.lane.b32.xlu0 %v1569_v8, %s1857_s6 }
  0xe7   : > { %v707_v12 = vpop.permute.xlu1 %706 }
  0xe8   : > { %v645_v13 = vpop.permute.xlu0 %644  ;;  %v964_v18 = vsel %vm959_vm6, %v947_v9, %v707_v12 }
  0xe9   : > { %596 = vrot.lane.b32.xlu1 %v1569_v8, %s1854_s24  ;;  %v948_v33 = vsel %vm942_vm5, %v931_v14, %v645_v13 }
  0xea   : > { %406 = vrot.lane.b32.xlu0 %v1568_v59, %s1852_s20 }
  0xeb   : > { %v2266_v17 = vpop.permute.xlu1 %518 }
  0xec   : > { %v2268_v19 = vpop.permute.xlu0 %456  ;;  %v915_v12 = vsel %vm908_vm3, %v898_v6, %v2266_v17 }
  0xed   : > { %848 = vrot.lane.b32.xlu1 %v1585_v16, %s1858_s9 }
  0xee   : > { %658 = vrot.lane.b32.xlu0 %v1584_v7, %s1855_s27 }
  0xef   : > { %v771_v20 = vpop.permute.xlu1 %770 }
  0xf0   : > { %v709_v22 = vpop.permute.xlu0 %708  ;;  %v981_v32 = vsel %vm976_vm7, %v964_v18, %v771_v20 }
  0xf1   : > { %470 = vrot.lane.b32.xlu1 %v1584_v7, %s1851_s11  ;;  %v965_v39 = vsel %vm959_vm6, %v948_v33, %v709_v22  ;;  %v1573_v7 = vld [vmem:[%s1960_s10 + $0xe1] sm:$0xff] }
  0xf2   : > { %408 = vrot.lane.b32.xlu0 %v1569_v8, %s1852_s20  ;;  %v1572_v8 = vld [vmem:[%s1960_s10 + $0xd9] sm:$0xff]  ;;  %s1484_s10 = sshll.u32 %s1833_s15, 3  ;;  %s1486_s20 = sshll.u32 %s1953_s4, 5 }
  0xf3   : > { %v583_v30 = vpop.permute.xlu1 %582  ;;  %p201_p13 = scmp.lt.s32.totalorder %s1484_s10, 15 }
  0xf4   : > { %v2282_v31 = vpop.permute.xlu0 %520  ;;  %v932_v20 = vsel %vm925_vm4, %v915_v12, %v583_v30  ;;  %v899_v30 = vsel %vm891_vm2, %v882_v28, %v2268_v19 }
  0xf5   : > { %722 = vrot.lane.b32.xlu1 %v1554_v26, %s1856_s28  ;;  %v916_v34 = vsel %vm908_vm3, %v899_v30, %v2282_v31  ;;  %s2595_s10 = smov (!%p201_p13, %s1484_s10), 15 }
  0xf6   : > { %660 = vrot.lane.b32.xlu0 %v1585_v16, %s1855_s27 }
  0xf7   : > { %v835_v36 = vpop.permute.xlu1 %834 }
  0xf8   : > { %v773_v37 = vpop.permute.xlu0 %772  ;;  %v998_v38 = vsel %vm993_vm8, %v981_v32, %v835_v36 }
  0xf9   : > { %534 = vrot.lane.b32.xlu1 %v1554_v26, %s1853_s21  ;;  %1649 = vmatprep.mubr.msk.f32.mxu0 %vm1015_vm9, %v998_v38  ;;  %v982_v42 = vsel %vm976_vm7, %v965_v39, %v773_v37 }
  0xfa   : > { %472 = vrot.lane.b32.xlu0 %v1585_v16, %s1851_s11  ;;  %s1485_s11 = sshll.u32 %s2595_s10, 1 }
  0xfb   : > { %v585_v50 = vpop.permute.xlu1 %584 }
  0xfc   : > { %v2303_v5 = vpop.permute.xlu0 %394  ;;  %v933_v32 = vsel %vm925_vm4, %v916_v34, %v585_v50 }
  0xfd   : > { %786 = vrot.lane.b32.xlu1 %v1570_v44, %s1857_s6  ;;  %v883_v33 = vsel %vm874_vm1, %v2066_v27, %v2303_v5 }
  0xfe   : > { %724 = vrot.lane.b32.xlu0 %v1555_v45, %s1856_s28 }
  0xff   : > { %v837_v48 = vpop.permute.xlu1 %836 }
 0x100   : > { %v647_v52 = vpop.permute.xlu0 %646  ;;  %v999_v51 = vsel %vm993_vm8, %v982_v42, %v837_v48 }
 0x101   : > { %598 = vrot.lane.b32.xlu1 %v1570_v44, %s1854_s24  ;;  %1650 = vmatmul.mubr.msk.f32.gmra.mxu0 %vm1015_vm9, %v999_v51  ;;  %v949_v22 = vsel %vm942_vm5, %v932_v20, %v647_v52 }
 0x102   : > { %536 = vrot.lane.b32.xlu0 %v1555_v45, %s1853_s21  ;;  %s205_s21 = sadd.s32 %s1486_s20, %s1485_s11 }
 0x103   : > { %v2317_v56 = vpop.permute.xlu1 %458 }
 0x104   : > { %v2319_v57 = vpop.permute.xlu0 %396  ;;  %v900_v39 = vsel %vm891_vm2, %v883_v33, %v2317_v56 }
 0x105   : > { %850 = vrot.lane.b32.xlu1 %v1586_v53, %s1858_s9  ;;  %v884_v27 = vsel %vm874_vm1, %v2076_v29, %v2319_v57 }
 0x106   : > { %788 = vrot.lane.b32.xlu0 %v1571_v55, %s1857_s6 }
 0x107   : > { %v711_v58 = vpop.permute.xlu1 %710 }
 0x108   : > { %v649_v59 = vpop.permute.xlu0 %648  ;;  %v966_v21 = vsel %vm959_vm6, %v949_v22, %v711_v58 }
 0x109   : > { %662 = vrot.lane.b32.xlu1 %v1586_v53, %s1855_s27  ;;  %v950_v36 = vsel %vm942_vm5, %v933_v32, %v649_v59 }
 0x10a   : > { %600 = vrot.lane.b32.xlu0 %v1571_v55, %s1854_s24  ;;  %s1487_s24 = sshll.u32 %s205_s21, 3 }
 0x10b   : > { %v523_v0 = vpop.permute.xlu1 %522 }
 0x10c   : > { %v2326_v49 = vpop.permute.xlu0 %460  ;;  %v917_v42 = vsel %vm908_vm3, %v900_v39, %v523_v0 }
 0x10d   : > { %664 = vrot.lane.b32.xlu1 %v1539_v62, %s1855_s27  ;;  %v901_v5 = vsel %vm891_vm2, %v884_v27, %v2326_v49 }
 0x10e   : > { %852 = vrot.lane.b32.xlu0 %v1539_v62, %s1858_s9 }
 0x10f   : > { %v775_v2 = vpop.permute.xlu1 %774 }
 0x110   : > { %v713_v3 = vpop.permute.xlu0 %712  ;;  %v983_v10 = vsel %vm976_vm7, %v966_v21, %v775_v2 }
 0x111   : > { %728 = vrot.lane.b32.xlu1 %v1557_v1, %s1856_s28  ;;  %v967_v23 = vsel %vm959_vm6, %v950_v36, %v713_v3 }
 0x112   : > { %726 = vrot.lane.b32.xlu0 %v1556_v54, %s1856_s28  ;;  %s2436_s28 = scalar_lea.vmem %s2577_s2, %s1487_s24  ;;  %s1859_s24 = smov [#allocation2]  }
 0x113   : > { %v587_v13 = vpop.permute.xlu1 %586  ;;  %s1761_s4 = sshll.u32 %s1859_s24, 4  ;;  %s1762_s4 = int_to_ptr.vmem [resolvable:$false] %s1761_s4 }
 0x114   : > { %v525_v16 = vpop.permute.xlu0 %524  ;;  %v934_v51 = vsel %vm925_vm4, %v917_v42, %v587_v13  ;;  %s1763_s27 = scalar_lea.vmem %s1762_s4, 64 }
 0x115   : > { %792 = vrot.lane.b32.xlu1 %v1573_v7, %s1857_s6  ;;  %v918_v56 = vsel %vm908_vm3, %v901_v5, %v525_v16 }
 0x116   : > { %790 = vrot.lane.b32.xlu0 %v1572_v8, %s1857_s6  ;;  %s1608_s6 = sshll.u32 %s1837_s16, 1 }
 0x117   : > { %v839_v25 = vpop.permute.xlu1 %838  ;;  %s1349_s7 = sadd.s32 %s1833_s15, %s1608_s6  ;;  %s1334_s15 = scalar_lea.sflag [#allocation3], %s190_s29 }
 0x118   : > { %v777_v26 = vpop.permute.xlu0 %776  ;;  %v1000_v17 = vsel %vm993_vm8, %v983_v10, %v839_v25  ;;  %s1609_s8 = sshll.u32 %s1349_s7, 5 }
 0x119   : > { %856 = vrot.lane.b32.xlu1 %v1589_v4, %s1858_s9  ;;  %1652 = vmatprep.mubr.msk.f32.mxu0 %vm1015_vm9, %v1000_v17  ;;  %v984_v11 = vsel %vm976_vm7, %v967_v23, %v777_v26  ;;  %s2529_s21 = scalar_lea.hbm %s2578_s3, %s1609_s8 }
 0x11a   : > { %854 = vrot.lane.b32.xlu0 %v1588_v24, %s1858_s9  ;;  %s192_s9 = scalar_lea.vmem [#allocation2], %s1482_s5 }
 0x11b   : > { %v589_v9 = vpop.permute.xlu1 %588  ;;  %s1353_s10 = sshll.u32 %s192_s9, 4  ;;  %s1354_s10 = int_to_ptr.vmem [resolvable:$true] %s1353_s10 }
 0x11c   : > { %v399_v18 = vpop.permute.xlu0 %398  ;;  %v935_v2 = vsel %vm925_vm4, %v918_v56, %v589_v9  ;;  %s1757_s16 = scalar_lea.vmem %s1354_s10, 32  ;;  %p1764_p4 = scmp.lt.s32.totalorder %s1354_s10, %s1762_s4 }
 0x11d   : > { %v885_v4 = vsel %vm874_vm1, %v2096_v35, %v399_v18  ;;  %p1758_p0 = scmp.ne.s32.totalorder %s1354_s10, %s1757_s16  ;;  %p1765_p5 = scmp.lt.s32.totalorder %s1763_s27, %s1757_s16 }
 0x11f   : > { %v841_v37 = vpop.permute.xlu1 %840  ;;  %p1759_p1 = pnand %p1758_p0, %p1931_p3  ;;  %p1766_p6 = por %p1765_p5, %p1764_p4 }
 0x120   : > { %v651_v38 = vpop.permute.xlu0 %650  ;;  %v1001_v40 = vsel %vm993_vm8, %v984_v11, %v841_v37 }
 0x121   : > { %1653 = vmatmul.mubr.msk.f32.gmra.mxu0 %vm1015_vm9, %v1001_v40  ;;  %v951_v53 = vsel %vm942_vm5, %v934_v51, %v651_v38  ;;  %p1760_p2 = pneg %p1759_p1 }
 0x123   : > { %v463_v19 = vpop.permute.xlu1 %462  ;;  %p1767_p7 = pnand %p1766_p6, %p1760_p2 }
 0x124   : > { %v401_v43 = vpop.permute.xlu0 %400  ;;  %v902_v24 = vsel %vm891_vm2, %v885_v4, %v463_v19 }
 0x125   : > { %v886_v35 = vsel %vm874_vm1, %v2110_v41, %v401_v43 }
 0x127   : > { %v715_v44 = vpop.permute.xlu1 %714 }
 0x128   : > { %v653_v31 = vpop.permute.xlu0 %652  ;;  %v968_v55 = vsel %vm959_vm6, %v951_v53, %v715_v44 }
 0x129   : > { %v952_v3 = vsel %vm942_vm5, %v935_v2, %v653_v31 }
 0x12b   : > { %v527_v45 = vpop.permute.xlu1 %526 }
 0x12c   : > { %v465_v47 = vpop.permute.xlu0 %464  ;;  %v919_v10 = vsel %vm908_vm3, %v902_v24, %v527_v45 }
 0x12d   : > { %v903_v18 = vsel %vm891_vm2, %v886_v35, %v465_v47 }
 0x12f   : > { %v779_v14 = vpop.permute.xlu1 %778 }
 0x130   : > { %v717_v50 = vpop.permute.xlu0 %716  ;;  %v985_v58 = vsel %vm976_vm7, %v968_v55, %v779_v14 }
 0x131   : > { %v969_v63 = vsel %vm959_vm6, %v952_v3, %v717_v50 }
 0x133   : > { %v591_v48 = vpop.permute.xlu1 %590 }
 0x134   : > { %v529_v52 = vpop.permute.xlu0 %528  ;;  %v936_v17 = vsel %vm925_vm4, %v919_v10, %v591_v48 }
 0x135   : > { %v920_v23 = vsel %vm908_vm3, %v903_v18, %v529_v52 }
 0x137   : > { %v843_v59 = vpop.permute.xlu1 %842 }
 0x138   : > { %v781_v62 = vpop.permute.xlu0 %780  ;;  %v1002_v1 = vsel %vm993_vm8, %v985_v58, %v843_v59 }
 0x139   : > { %1655 = vmatprep.mubr.msk.f32.mxu1 %vm1015_vm9, %v1002_v1  ;;  %v986_v6 = vsel %vm976_vm7, %v969_v63, %v781_v62 }
 0x13b   : > { %v593_v0 = vpop.permute.xlu1 %592 }
 0x13c   : > { %v403_v54 = vpop.permute.xlu0 %402  ;;  %v937_v38 = vsel %vm925_vm4, %v920_v23, %v593_v0 }
 0x13d   : > { %v887_v52 = vsel %vm874_vm1, %v2143_v60, %v403_v54 }
 0x13f   : > { %v845_v7 = vpop.permute.xlu1 %844 }
 0x140   : > { %v655_v8 = vpop.permute.xlu0 %654  ;;  %v1003_v29 = vsel %vm993_vm8, %v986_v6, %v845_v7 }
 0x141   : > { %1656 = vmatmul.mubr.msk.f32.vlgmr.msra.gmra.mxu1 %vm1015_vm9, %v1003_v29  ;;  %v953_v28 = vsel %vm942_vm5, %v936_v17, %v655_v8 }
 0x143   : > { %v467_v57 = vpop.permute.xlu1 %466 }
 0x144   : > { %v405_v49 = vpop.permute.xlu0 %404  ;;  %v904_v51 = vsel %vm891_vm2, %v887_v52, %v467_v57 }
 0x145   : > { %v888_v0 = vsel %vm874_vm1, %v2168_v15, %v405_v49 }
 0x147   : > { %v719_v12 = vpop.permute.xlu1 %718 }
 0x148   : > { %v657_v13 = vpop.permute.xlu0 %656  ;;  %v970_v30 = vsel %vm959_vm6, %v953_v28, %v719_v12 }
 0x149   : > { %v954_v40 = vsel %vm942_vm5, %v937_v38, %v657_v13 }
 0x14b   : > { %v531_v16 = vpop.permute.xlu1 %530 }
 0x14c   : > { %v469_v20 = vpop.permute.xlu0 %468  ;;  %v921_v53 = vsel %vm908_vm3, %v904_v51, %v531_v16 }
 0x14d   : > { %v905_v54 = vsel %vm891_vm2, %v888_v0, %v469_v20 }
 0x14f   : > { %v783_v22 = vpop.permute.xlu1 %782 }
 0x150   : > { %v721_v21 = vpop.permute.xlu0 %720  ;;  %v987_v34 = vsel %vm976_vm7, %v970_v30, %v783_v22 }
 0x151   : > { %v971_v19 = vsel %vm959_vm6, %v954_v40, %v721_v21 }
 0x153   : > { %v595_v25 = vpop.permute.xlu1 %594 }
 0x154   : > { %v533_v26 = vpop.permute.xlu0 %532  ;;  %v938_v59 = vsel %vm925_vm4, %v921_v53, %v595_v25 }
 0x155   : > { %v922_v2 = vsel %vm908_vm3, %v905_v54, %v533_v26 }
 0x157   : > { %v847_v9 = vpop.permute.xlu1 %846 }
 0x158   : > { %v785_v32 = vpop.permute.xlu0 %784  ;;  %v1004_v36 = vsel %vm993_vm8, %v987_v34, %v847_v9 }
 0x159   : > { %1658 = vmatprep.mubr.msk.f32.mxu1 %vm1015_vm9, %v1004_v36  ;;  %v988_v44 = vsel %vm976_vm7, %v971_v19, %v785_v32 }
 0x15b   : > { %v597_v11 = vpop.permute.xlu1 %596 }
 0x15c   : > { %v407_v37 = vpop.permute.xlu0 %406  ;;  %v939_v6 = vsel %vm925_vm4, %v922_v2, %v597_v11 }
 0x15d   : > { %v889_v22 = vsel %vm874_vm1, %v2211_v46, %v407_v37 }
 0x15f   : > { %v849_v31 = vpop.permute.xlu1 %848 }
 0x160   : > { %v659_v45 = vpop.permute.xlu0 %658  ;;  %v1005_v41 = vsel %vm993_vm8, %v988_v44, %v849_v31 }
 0x161   : > { %1659 = vmatmul.mubr.msk.f32.gmra.mxu1 %vm1015_vm9, %v1005_v41  ;;  %v955_v62 = vsel %vm942_vm5, %v938_v59, %v659_v45 }
 0x163   : > { %v471_v43 = vpop.permute.xlu1 %470 }
 0x164   : > { %v409_v47 = vpop.permute.xlu0 %408  ;;  %v906_v26 = vsel %vm891_vm2, %v889_v22, %v471_v43 }
 0x165   : > { %v890_v4 = vsel %vm874_vm1, %v2237_v61, %v409_v47 }
 0x167   : > { %v723_v14 = vpop.permute.xlu1 %722 }
 0x168   : > { %v661_v50 = vpop.permute.xlu0 %660  ;;  %v972_v1 = vsel %vm959_vm6, %v955_v62, %v723_v14 }
 0x169   : > { %v956_v7 = vsel %vm942_vm5, %v939_v6, %v661_v50 }
 0x16b   : > { %v535_v33 = vpop.permute.xlu1 %534 }
 0x16c   : > { %v473_v39 = vpop.permute.xlu0 %472  ;;  %v923_v30 = vsel %vm908_vm3, %v906_v26, %v535_v33 }
 0x16d   : > { %v907_v17 = vsel %vm891_vm2, %v890_v4, %v473_v39 }
 0x16f   : > { %v787_v42 = vpop.permute.xlu1 %786 }
 0x170   : > { %v725_v48 = vpop.permute.xlu0 %724  ;;  %v989_v27 = vsel %vm976_vm7, %v972_v1, %v787_v42 }
 0x171   : > { %v973_v8 = vsel %vm959_vm6, %v956_v7, %v725_v48 }
 0x173   : > { %v599_v55 = vpop.permute.xlu1 %598 }
 0x174   : > { %v537_v58 = vpop.permute.xlu0 %536  ;;  %v940_v36 = vsel %vm925_vm4, %v923_v30, %v599_v55 }
 0x175   : > { %v924_v46 = vsel %vm908_vm3, %v907_v17, %v537_v58 }
 0x177   : > { %v851_v5 = vpop.permute.xlu1 %850 }
 0x178   : > { %v789_v56 = vpop.permute.xlu0 %788  ;;  %v1006_v60 = vsel %vm993_vm8, %v989_v27, %v851_v5 }
 0x179   : > { %1661 = vmatprep.mubr.msk.f32.mxu1 %vm1015_vm9, %v1006_v60  ;;  %v990_v29 = vsel %vm976_vm7, %v973_v8, %v789_v56 }
 0x17b   : > { %v663_v3 = vpop.permute.xlu1 %662 }
 0x17c   : > { %v601_v63 = vpop.permute.xlu0 %600  ;;  %v957_v23 = vsel %vm942_vm5, %v940_v36, %v663_v3 }
 0x17d   : > { %v941_v35 = vsel %vm925_vm4, %v924_v46, %v601_v63 }
 0x17f   : > { %v665_v57 = vpop.permute.xlu1 %664 }
 0x180   : > { %v853_v15 = vpop.permute.xlu0 %852  ;;  %v958_v11 = vsel %vm942_vm5, %v941_v35, %v665_v57 }
 0x181   : > { %v1007_v49 = vsel %vm993_vm8, %v990_v29, %v853_v15  ;;  %v1645_v12 = vpop.f32.mrf.mxu0 }
 0x182   : > { %1662 = vmatmul.mubr.msk.f32.gmra.mxu1 %vm1015_vm9, %v1007_v49  ;;  %1214 = vst.msk [vmem:[%s2436_s28 + $0x8] sm:$0xff] %vm891_vm2, %v1645_v12  ;;  %v1267_v13 = vmul.f32 %v1645_v12, %v1645_v12  ;;  %v1230_v24 = vsel %vm891_vm2, %v1645_v12, 0.0 }
 0x183   : > { %v729_v16 = vpop.permute.xlu1 %728  ;;  %v1134_v21 = vpop.f32.mrf.mxu0 }
 0x184   : > { %v727_v20 = vpop.permute.xlu0 %726  ;;  %1213 = vst.msk [vmem:[%s2436_s28] sm:$0xff] %vm891_vm2, %v1134_v21  ;;  %v1229_v10 = vsel %vm891_vm2, %v1134_v21, 0.0  ;;  %v1266_v25 = vmul.f32 %v1134_v21, %v1134_v21  ;;  %v1283_v34 = vsel %vm891_vm2, %v1267_v13, 0.0  ;;  %v975_v37 = vsel %vm959_vm6, %v958_v11, %v729_v16 }
 0x185   : > { %v1231_v28 = vadd.f32 %v1230_v24, %v1229_v10  ;;  %v974_v38 = vsel %vm959_vm6, %v957_v23, %v727_v20 }
 0x186   : > { %v1282_v61 = vsel %vm891_vm2, %v1266_v25, 0.0 }
 0x187   : > { %v793_v9 = vpop.permute.xlu1 %792  ;;  %v1284_v18 = vadd.f32 %v1283_v34, %v1282_v61 }
 0x188   : > { %v791_v32 = vpop.permute.xlu0 %790  ;;  %v992_v40 = vsel %vm976_vm7, %v975_v37, %v793_v9 }
 0x189   : > { %v991_v19 = vsel %vm976_vm7, %v974_v38, %v791_v32 }
 0x18b   : > { %v857_v44 = vpop.permute.xlu1 %856 }
 0x18c   : > { %v855_v31 = vpop.permute.xlu0 %854  ;;  %v1009_v45 = vsel %vm993_vm8, %v992_v40, %v857_v44 }
 0x18d   : > { %v1008_v41 = vsel %vm993_vm8, %v991_v19, %v855_v31 }
 0x18e   : > { %1664 = vmatprep.mubr.msk.f32.mxu1 %vm1015_vm9, %v1008_v41 }
 0x18f   : > { %1665 = vmatmul.mubr.msk.f32.gmra.mxu1 %vm1015_vm9, %v1009_v45 }
 0x1a1   : > { %v1648_v43 = vpop.f32.mrf.mxu0 }
 0x1a2   : > { %1216 = vst.msk [vmem:[%s2436_s28 + $0x18] sm:$0xff] %vm891_vm2, %v1648_v43  ;;  %v1269_v14 = vmul.f32 %v1648_v43, %v1648_v43  ;;  %v1234_v42 = vsel %vm891_vm2, %v1648_v43, 0.0 }
 0x1a3   : > { %v1144_v47 = vpop.f32.mrf.mxu0 }
 0x1a4   : > { %1215 = vst.msk [vmem:[%s2436_s28 + $0x10] sm:$0xff] %vm891_vm2, %v1144_v47  ;;  %v1232_v50 = vsel %vm891_vm2, %v1144_v47, 0.0  ;;  %v1268_v33 = vmul.f32 %v1144_v47, %v1144_v47  ;;  %v1287_v53 = vsel %vm891_vm2, %v1269_v14, 0.0 }
 0x1a5   : > { %v1233_v39 = vadd.f32 %v1232_v50, %v1231_v28 }
 0x1a6   : > { %v1285_v48 = vsel %vm891_vm2, %v1268_v33, 0.0 }
 0x1a7   : > { %v1286_v52 = vadd.f32 %v1285_v48, %v1284_v18  ;;  %v1235_v51 = vadd.f32 %v1234_v42, %v1233_v39 }
 0x1a9   : > { %v1288_v55 = vadd.f32 %v1287_v53, %v1286_v52 }
 0x1c1   : > { %v1651_v58 = vpop.f32.mrf.mxu0 }
 0x1c2   : > { %1218 = vst.msk [vmem:[%s2436_s28 + $0x28] sm:$0xff] %vm891_vm2, %v1651_v58  ;;  %v1271_v62 = vmul.f32 %v1651_v58, %v1651_v58  ;;  %v1238_v56 = vsel %vm891_vm2, %v1651_v58, 0.0 }
 0x1c3   : > { %v1154_v59 = vpop.f32.mrf.mxu0 }
 0x1c4   : > { %1217 = vst.msk [vmem:[%s2436_s28 + $0x20] sm:$0xff] %vm891_vm2, %v1154_v59  ;;  %v1236_v1 = vsel %vm891_vm2, %v1154_v59, 0.0  ;;  %v1270_v27 = vmul.f32 %v1154_v59, %v1154_v59  ;;  %v1291_v2 = vsel %vm891_vm2, %v1271_v62, 0.0 }
 0x1c5   : > { %v1237_v5 = vadd.f32 %v1236_v1, %v1235_v51 }
 0x1c6   : > { %v1289_v60 = vsel %vm891_vm2, %v1270_v27, 0.0 }
 0x1c7   : > { %v1290_v0 = vadd.f32 %v1289_v60, %v1288_v55  ;;  %v1239_v54 = vadd.f32 %v1238_v56, %v1237_v5 }
 0x1c9   : > { %v1292_v3 = vadd.f32 %v1291_v2, %v1290_v0 }
 0x1e1   : > { %v1654_v63 = vpop.f32.mrf.mxu0 }
 0x1e2   : > { %1220 = vst.msk [vmem:[%s2436_s28 + $0x38] sm:$0xff] %vm891_vm2, %v1654_v63  ;;  %v1273_v7 = vmul.f32 %v1654_v63, %v1654_v63  ;;  %v1242_v15 = vsel %vm891_vm2, %v1654_v63, 0.0 }
 0x1e3   : > { %v1164_v6 = vpop.f32.mrf.mxu0 }
 0x1e4   : > { %1219 = vst.msk [vmem:[%s2436_s28 + $0x30] sm:$0xff] %vm891_vm2, %v1164_v6  ;;  %v1240_v8 = vsel %vm891_vm2, %v1164_v6, 0.0  ;;  %v1272_v29 = vmul.f32 %v1164_v6, %v1164_v6  ;;  %v1295_v16 = vsel %vm891_vm2, %v1273_v7, 0.0 }
 0x1e5   : > { %v1241_v57 = vadd.f32 %v1240_v8, %v1239_v54 }
 0x1e6   : > { %v1293_v49 = vsel %vm891_vm2, %v1272_v29, 0.0 }
 0x1e7   : > { %v1243_v12 = vadd.f32 %v1242_v15, %v1241_v57  ;;  %v1294_v13 = vadd.f32 %v1293_v49, %v1292_v3 }
 0x1e9   : > { %v1296_v20 = vadd.f32 %v1295_v16, %v1294_v13 }
 0x201   : > { %v1657_v22 = vpop.f32.mrf.mxu1 }
 0x202   : > { %1222 = vst.msk [vmem:[%s2436_s28 + $0x48] sm:$0xff] %vm891_vm2, %v1657_v22  ;;  %v1275_v4 = vmul.f32 %v1657_v22, %v1657_v22  ;;  %v1246_v26 = vsel %vm891_vm2, %v1657_v22, 0.0 }
 0x203   : > { %v1174_v21 = vpop.f32.mrf.mxu1 }
 0x204   : > { %1221 = vst.msk [vmem:[%s2436_s28 + $0x40] sm:$0xff] %vm891_vm2, %v1174_v21  ;;  %v1244_v24 = vsel %vm891_vm2, %v1174_v21, 0.0  ;;  %v1274_v10 = vmul.f32 %v1174_v21, %v1174_v21  ;;  %v1299_v46 = vsel %vm891_vm2, %v1275_v4, 0.0 }
 0x205   : > { %v1245_v25 = vadd.f32 %v1244_v24, %v1243_v12 }
 0x206   : > { %v1297_v17 = vsel %vm891_vm2, %v1274_v10, 0.0 }
 0x207   : > { %v1298_v28 = vadd.f32 %v1297_v17, %v1296_v20  ;;  %v1247_v30 = vadd.f32 %v1246_v26, %v1245_v25 }
 0x209   : > { %v1300_v34 = vadd.f32 %v1299_v46, %v1298_v28 }
 0x221   : > { %v1660_v61 = vpop.f32.mrf.mxu1 }
 0x222   : > { %1224 = vst.msk [vmem:[%s2436_s28 + $0x58] sm:$0xff] %vm891_vm2, %v1660_v61  ;;  %v1277_v37 = vmul.f32 %v1660_v61, %v1660_v61  ;;  %v1250_v19 = vsel %vm891_vm2, %v1660_v61, 0.0 }
 0x223   : > { %v1184_v9 = vpop.f32.mrf.mxu1 }
 0x224   : > { %1223 = vst.msk [vmem:[%s2436_s28 + $0x50] sm:$0xff] %vm891_vm2, %v1184_v9  ;;  %v1276_v32 = vmul.f32 %v1184_v9, %v1184_v9  ;;  %v1248_v35 = vsel %vm891_vm2, %v1184_v9, 0.0  ;;  %v1303_v45 = vsel %vm891_vm2, %v1277_v37, 0.0 }
 0x225   : > { %v1249_v11 = vadd.f32 %v1248_v35, %v1247_v30 }
 0x226   : > { %v1301_v23 = vsel %vm891_vm2, %v1276_v32, 0.0 }
 0x227   : > { %v1302_v40 = vadd.f32 %v1301_v23, %v1300_v34  ;;  %v1251_v31 = vadd.f32 %v1250_v19, %v1249_v11 }
 0x229   : > { %v1304_v47 = vadd.f32 %v1303_v45, %v1302_v40 }
 0x242   : > { %v1663_v36 = vpop.f32.mrf.mxu1 }
 0x243   : > { %1226 = vst.msk [vmem:[%s2436_s28 + $0x68] sm:$0xff] %vm891_vm2, %v1663_v36  ;;  %v1279_v14 = vmul.f32 %v1663_v36, %v1663_v36  ;;  %v1254_v39 = vsel %vm891_vm2, %v1663_v36, 0.0 }
 0x244   : > { %v1194_v18 = vpop.f32.mrf.mxu1 }
 0x245   : > { %1225 = vst.msk [vmem:[%s2436_s28 + $0x60] sm:$0xff] %vm891_vm2, %v1194_v18  ;;  %v1278_v38 = vmul.f32 %v1194_v18, %v1194_v18  ;;  %v1252_v44 = vsel %vm891_vm2, %v1194_v18, 0.0  ;;  %v1307_v52 = vsel %vm891_vm2, %v1279_v14, 0.0 }
 0x246   : > { %v1253_v43 = vadd.f32 %v1252_v44, %v1251_v31 }
 0x247   : > { %v1305_v41 = vsel %vm891_vm2, %v1278_v38, 0.0 }
 0x248   : > { %v1306_v50 = vadd.f32 %v1305_v41, %v1304_v47  ;;  %v1255_v48 = vadd.f32 %v1254_v39, %v1253_v43 }
 0x24a   : > { %v1308_v59 = vadd.f32 %v1307_v52, %v1306_v50 }
 0x24f   : > { %v1666_v33 = vpop.f32.mrf.mxu1 }
 0x250   : > { %1228 = vst.msk [vmem:[%s2436_s28 + $0x78] sm:$0xff] %vm891_vm2, %v1666_v33  ;;  %v1281_v51 = vmul.f32 %v1666_v33, %v1666_v33  ;;  %v1258_v62 = vsel %vm891_vm2, %v1666_v33, 0.0 }
 0x251   : > { %v1204_v42 = vpop.f32.mrf.mxu1 }
 0x252   : > { %1227 = vst.msk [vmem:[%s2436_s28 + $0x70] sm:$0xff] %vm891_vm2, %v1204_v42  ;;  %v1256_v53 = vsel %vm891_vm2, %v1204_v42, 0.0  ;;  %v1280_v55 = vmul.f32 %v1204_v42, %v1204_v42  ;;  %v1311_v56 = vsel %vm891_vm2, %v1281_v51, 0.0 }
 0x253   : > { %v1257_v58 = vadd.f32 %v1256_v53, %v1255_v48 }
 0x254   : > { %v1309_v1 = vsel %vm891_vm2, %v1280_v55, 0.0 }
 0x255   : > { %v1259_v27 = vadd.f32 %v1258_v62, %v1257_v58  ;;  %v1310_v5 = vadd.f32 %v1309_v1, %v1308_v59 }
 0x257   : > { %v1260_v60 = vrot.slane %v1259_v27, 4  ;;  %v1312_v0 = vadd.f32 %v1311_v56, %v1310_v5 }
 0x259   : > { %v1261_v54 = vadd.f32 %v1260_v60, %v1259_v27  ;;  %v1313_v2 = vrot.slane %v1312_v0, 4 }
 0x25b   : > { %v1262_v3 = vrot.slane %v1261_v54, 2  ;;  %v1314_v63 = vadd.f32 %v1313_v2, %v1312_v0 }
 0x25d   : > { %v1263_v6 = vadd.f32 %v1262_v3, %v1261_v54  ;;  %v1315_v7 = vrot.slane %v1314_v63, 2 }
 0x25f   : > { %v1264_v8 = vrot.slane %v1263_v6, 1  ;;  %v1316_v29 = vadd.f32 %v1315_v7, %v1314_v63 }
 0x261   : > { %v1317_v57 = vrot.slane %v1316_v29, 1  ;;  %v1265_v15 = vadd.f32 %v1264_v8, %v1263_v6 }
 0x263   : > { %v1318_v49 = vadd.f32 %v1317_v57, %v1316_v29 }
 0x265   : > { %v1320_v12 = vsel %vm1319_vm10, %v1265_v15, %v1318_v49 }
 0x266   : > { %1322 = vst.msk [vmem:[%s192_s9] sm:$0x3] %vm1321_vm11, %v1320_v12 }
 0x267   : > { %1770 = shalt.err (!%p1767_p7)
}
 0x268   : > { %s1771_s28 = scalar_lea.hbm %s2529_s21, 32  ;;  %s1775_s6 = scalar_lea.hbm %s2578_s3, 128 }
 0x269   : > { %p1772_p9 = scmp.ne.s32.totalorder %s2529_s21, %s1771_s28  ;;  %p1776_p12 = scmp.lt.s32.totalorder %s2529_s21, %s2578_s3 }
 0x26a   : > { %p1777_p13 = scmp.lt.s32.totalorder %s1775_s6, %s1771_s28 }
 0x26b   : > { %p1773_p10 = pnand %p1772_p9, %p1931_p3 }
 0x26c   : > { %p1778_p0 = por %p1777_p13, %p1776_p12 }
 0x26d   : > { %p1774_p11 = pneg %p1773_p10 }
 0x26f   : > { %p1779_p1 = pnand %p1778_p0, %p1774_p11 }
 0x271   : > { %1782 = shalt.err (!%p1779_p1)
}
 0x272   : > { %1678 = dma.vmem_to_hbm [thread:$0]  (%p1931_p3), %s1354_s10, 32, %s2529_s21, %s1334_s15  }
 0x273 PF: > { %p1684_p2 = scmp.ge.s32.totalorder %s1849_s19, 2  ;;  %s1378_s9 = sand.u32 1, %s1821_s12  }
 0x274   : > { %s1379_s11 = scalar_lea.sflag [#allocation3], %s1378_s9 }
 0x275   : > { %p1681_p4 = pnand %p1684_p2, %p1940_p8 }
 0x277   : > { %p1682_p5 = pneg %p1681_p4 }
 0x279   : > { %1816 = dma.done.wait (%p1682_p5), %s1379_s11, 32  }
 0x27a   : > { %1818 = vsyncadd (%p1682_p5), %s1379_s11, 4294967264  ;;  %s17_s19 = sadd.s32 1, %s1849_s19   ;;  %s2581_s12 = smov %s1825_s13 }
 0x27b   : > { %p14_p6 = scmp.ge.s32.totalorder %s17_s19, 6   ;;  %s2582_s13 = smov %s1829_s14 }
 0x27c   : > { %s2583_s14 = smov %s1949_s30  ;;  %s2584_s15 = smov %s1841_s17 }
 0x27d   : > { %s2585_s16 = smov %s1845_s18  ;;  %s2586_s17 = smov %s2589_s22 }
 0x27e   : > { %s2587_s18 = smov %s2593_s23  ;;  %16 = sbr.rel (!%p14_p6) target bundleno = 5 (0x5), region = 78 }
 0x283   :  { %1384 = vsyncpa [#allocation3], 1 }
 0x284   :  { %1386 = vsyncpa [#allocation3 + $0x1], 1 }

</bundles_post_ra>
